<compile_context>
chip_gen: v7x
topology: tpu7x:2x2x1
jax: 0.10.0
libtpu: 0.0.40
codegen_flags: <defaults>
</compile_context>

<pallas_src>
import functools

import jax
import jax.numpy as jnp
from jax.experimental import pallas as pl
from jax.experimental.pallas import tpu as pltpu

_LANE = 128      # lane width / MXU granule
_SUBLANE = 8     # sublane granule


def _round_up(v, m):
    return ((v + m - 1) // m) * m


def _leaky_relu(v, slope=0.01):
    return jnp.where(v > 0, v, slope * v)


def resnet_kernel(x_ref, w1_ref, b1_ref, w2_ref, w3_ref, w4_ref, wo_ref, o_ref):
    # x tile: (TILE_B, Dp) bf16; weights bf16; bias f32.
    x_bf16 = x_ref[...]
    x = x_bf16.astype(jnp.float32)

    # h1: Linear(D, D, bias=True) -> LeakyReLU -> Dropout(identity) ; +x
    h1 = jnp.dot(x_bf16, w1_ref[...], preferred_element_type=jnp.float32)
    h1 = h1 + b1_ref[...]
    out = _leaky_relu(h1) + x

    # h2..h4: Linear(D, D, bias=False) -> LeakyReLU ; residual add
    h2 = jnp.dot(out.astype(jnp.bfloat16), w2_ref[...],
                 preferred_element_type=jnp.float32)
    out = _leaky_relu(h2) + out

    h3 = jnp.dot(out.astype(jnp.bfloat16), w3_ref[...],
                 preferred_element_type=jnp.float32)
    out = _leaky_relu(h3) + out

    h4 = jnp.dot(out.astype(jnp.bfloat16), w4_ref[...],
                 preferred_element_type=jnp.float32)
    out = _leaky_relu(h4) + out

    # output head: (D,1) padded to (D,128) -> lane-dense (TILE_B,128) store.
    logits = jnp.dot(out.astype(jnp.bfloat16), wo_ref[...],
                     preferred_element_type=jnp.float32)
    o_ref[...] = (1.0 / (1.0 + jnp.exp(-logits))).astype(o_ref.dtype)


def _vmem_limit_bytes():
    try:
        phys = pltpu.get_tpu_info().vmem_capacity_bytes
    except Exception:
        phys = 64 << 20  # conservative fallback (v7x per-TC VMEM)
    return int(phys * 3 // 4)


@functools.partial(jax.jit, static_argnames=())
def resnet_forward(x, params):
    """x: (B, D) float32.  params: dict with w1,b1,w2,w3,w4,wout (all (in,out), f32)."""
    B, D = x.shape
    Dp = max(_round_up(D, _LANE), _LANE)

    # Batch padding / tiling: tile is a multiple of 8 sublanes, capped at 256.
    B8 = _round_up(B, _SUBLANE)
    tile_b = min(256, B8)
    Bp = _round_up(B8, tile_b)
    grid = (Bp // tile_b,)

    f32 = jnp.float32
    bf16 = jnp.bfloat16

    def pad2(a, rows, cols):
        return jnp.pad(a, ((0, rows - a.shape[0]), (0, cols - a.shape[1])))

    # Pad (zero padding keeps the residual chain exact on padded features:
    # 0 @ W = 0, leaky(0) = 0, 0 + 0 = 0) and cast MXU operands to bf16.
    x_p = pad2(x.astype(f32), Bp, Dp).astype(bf16)
    w1 = pad2(params["w1"].astype(f32), Dp, Dp).astype(bf16)
    b1 = pad2(params["b1"].astype(f32), 1, Dp)                 # stays f32
    w2 = pad2(params["w2"].astype(f32), Dp, Dp).astype(bf16)
    w3 = pad2(params["w3"].astype(f32), Dp, Dp).astype(bf16)
    w4 = pad2(params["w4"].astype(f32), Dp, Dp).astype(bf16)
    wo = pad2(params["wout"].astype(f32), Dp, _LANE).astype(bf16)

    act_spec = pl.BlockSpec((tile_b, Dp), lambda i: (i, 0))
    wgt_spec = pl.BlockSpec((Dp, Dp), lambda i: (0, 0))
    bias_spec = pl.BlockSpec((1, Dp), lambda i: (0, 0))
    wo_spec = pl.BlockSpec((Dp, _LANE), lambda i: (0, 0))
    out_spec = pl.BlockSpec((tile_b, _LANE), lambda i: (i, 0))

    flops = 2 * Bp * Dp * Dp * 4 + 2 * Bp * Dp * _LANE + 10 * Bp * Dp
    bytes_accessed = (x_p.size * 2 + 4 * Dp * Dp * 2 + Dp * 4 +
                      Dp * _LANE * 2 + Bp * _LANE * 4)
    cost = pl.CostEstimate(flops=flops,
                           transcendentals=Bp * _LANE,
                           bytes_accessed=bytes_accessed)

    y_pad = pl.pallas_call(
        resnet_kernel,
        out_shape=jax.ShapeDtypeStruct((Bp, _LANE), jnp.float32),
        grid=grid,
        in_specs=[act_spec, wgt_spec, bias_spec, wgt_spec, wgt_spec, wgt_spec,
                  wo_spec],
        out_specs=out_spec,
        compiler_params=pltpu.CompilerParams(
            dimension_semantics=("parallel",),
            vmem_limit_bytes=_vmem_limit_bytes(),
        ),
        cost_estimate=cost,
    )(x_p, w1, b1, w2, w3, w4, wo)

    return y_pad[:B, :1]


def init_params(key, input_size):
    D = input_size
    keys = jax.random.split(key, 6)
    # Deterministic synthetic init (kaiming-uniform-ish bound like PyTorch Linear).
    bound = 1.0 / jnp.sqrt(D)

    def u(k, shape):
        return jax.random.uniform(k, shape, jnp.float32, -bound, bound)

    return {
        # stored pre-transposed: (in, out)
        "w1": u(keys[0], (D, D)),
        "b1": u(keys[1], (1, D)),
        "w2": u(keys[2], (D, D)),
        "w3": u(keys[3], (D, D)),
        "w4": u(keys[4], (D, D)),
        "wout": u(keys[5], (D, 1)),
    }


def reference_forward(x, p):
    # Pure-JAX f32 reference of the same eval-mode forward.
    leaky = lambda v: jnp.where(v > 0, v, 0.01 * v)
    out = leaky(x @ p["w1"] + p["b1"]) + x
    out = leaky(out @ p["w2"]) + out
    out = leaky(out @ p["w3"]) + out
    out = leaky(out @ p["w4"]) + out
    return jax.nn.sigmoid(out @ p["wout"])


if __name__ == "__main__":
    key = jax.random.PRNGKey(0)
    k_x, k_p = jax.random.split(key)

    B, INPUT_SIZE = 8, 32
    x = jax.random.normal(k_x, (B, INPUT_SIZE), dtype=jnp.float32)
    params = init_params(k_p, INPUT_SIZE)

    y = resnet_forward(x, params)
    y = jax.block_until_ready(y)

    y_ref = reference_forward(x, params)
    assert y.shape == (B, 1), y.shape
    # bf16 MXU inputs with f32 accumulation -> relaxed tolerance vs f32 reference.
    assert jnp.allclose(y, y_ref, atol=2e-2, rtol=2e-2), (y, y_ref)

    print("KERNEL_OK")
</pallas_src>

<mosaic_0001>
module attributes {stable_mosaic.version = 11 : i64} {
  func.func @resnet_kernel(%arg0: i32, %arg1: memref<8x128xbf16, #tpu.memory_space<vmem>>, %arg2: memref<128x128xbf16, #tpu.memory_space<vmem>>, %arg3: memref<1x128xf32, #tpu.memory_space<vmem>>, %arg4: memref<128x128xbf16, #tpu.memory_space<vmem>>, %arg5: memref<128x128xbf16, #tpu.memory_space<vmem>>, %arg6: memref<128x128xbf16, #tpu.memory_space<vmem>>, %arg7: memref<128x128xbf16, #tpu.memory_space<vmem>>, %arg8: memref<8x128xf32, #tpu.memory_space<vmem>>) attributes {dimension_semantics = [#tpu.dimension_semantics<parallel>], iteration_bounds = array<i64: 1>, scalar_prefetch = 0 : i64, scratch_operands = 0 : i64, tpu.core_type = #tpu.core_type<tc>, window_params = [{transform_indices = @transform_0, window_bounds = array<i64: 8, 128>}, {pipeline_mode = #tpu.pipeline_mode<synchronous>, transform_indices = @transform_1, window_bounds = array<i64: 128, 128>}, {pipeline_mode = #tpu.pipeline_mode<synchronous>, transform_indices = @transform_2, window_bounds = array<i64: 1, 128>}, {pipeline_mode = #tpu.pipeline_mode<synchronous>, transform_indices = @transform_3, window_bounds = array<i64: 128, 128>}, {pipeline_mode = #tpu.pipeline_mode<synchronous>, transform_indices = @transform_4, window_bounds = array<i64: 128, 128>}, {pipeline_mode = #tpu.pipeline_mode<synchronous>, transform_indices = @transform_5, window_bounds = array<i64: 128, 128>}, {pipeline_mode = #tpu.pipeline_mode<synchronous>, transform_indices = @transform_6, window_bounds = array<i64: 128, 128>}, {transform_indices = @transform_7, window_bounds = array<i64: 8, 128>}]} {
    %c0 = arith.constant 0 : index
    %c0_0 = arith.constant 0 : index
    %0 = vector.load %arg1[%c0, %c0_0] : memref<8x128xbf16, #tpu.memory_space<vmem>>, vector<8x128xbf16>
    %1 = arith.extf %0 : vector<8x128xbf16> to vector<8x128xf32>
    %c0_1 = arith.constant 0 : index
    %c0_2 = arith.constant 0 : index
    %2 = vector.load %arg2[%c0_1, %c0_2] : memref<128x128xbf16, #tpu.memory_space<vmem>>, vector<128x128xbf16>
    %cst = arith.constant dense<0.000000e+00> : vector<8x128xf32>
    %3 = tpu.matmul %0, %2, %cst {dimension_numbers = #tpu.dot_dimension_numbers<[1], [0], [0], [1], [0, 0, 1, 1], [], []>} : vector<8x128xbf16>, vector<128x128xbf16>, vector<8x128xf32> -> vector<8x128xf32>
    %c0_3 = arith.constant 0 : index
    %c0_4 = arith.constant 0 : index
    %4 = vector.load %arg3[%c0_3, %c0_4] : memref<1x128xf32, #tpu.memory_space<vmem>>, vector<1x128xf32>
    %5 = vector.broadcast %4 : vector<1x128xf32> to vector<8x128xf32>
    %6 = arith.addf %3, %5 : vector<8x128xf32>
    %cst_5 = arith.constant 0.000000e+00 : f32
    %7 = vector.broadcast %cst_5 : f32 to vector<8x128xf32>
    %8 = arith.cmpf ogt, %6, %7 : vector<8x128xf32>
    %cst_6 = arith.constant 0.00999999977 : f32
    %9 = vector.broadcast %cst_6 : f32 to vector<8x128xf32>
    %10 = arith.mulf %9, %6 : vector<8x128xf32>
    %11 = arith.select %8, %6, %10 : vector<8x128xi1>, vector<8x128xf32>
    %12 = arith.addf %11, %1 : vector<8x128xf32>
    %13 = arith.truncf %12 : vector<8x128xf32> to vector<8x128xbf16>
    %c0_7 = arith.constant 0 : index
    %c0_8 = arith.constant 0 : index
    %14 = vector.load %arg4[%c0_7, %c0_8] : memref<128x128xbf16, #tpu.memory_space<vmem>>, vector<128x128xbf16>
    %cst_9 = arith.constant dense<0.000000e+00> : vector<8x128xf32>
    %15 = tpu.matmul %13, %14, %cst_9 {dimension_numbers = #tpu.dot_dimension_numbers<[1], [0], [0], [1], [0, 0, 1, 1], [], []>} : vector<8x128xbf16>, vector<128x128xbf16>, vector<8x128xf32> -> vector<8x128xf32>
    %cst_10 = arith.constant 0.000000e+00 : f32
    %16 = vector.broadcast %cst_10 : f32 to vector<8x128xf32>
    %17 = arith.cmpf ogt, %15, %16 : vector<8x128xf32>
    %cst_11 = arith.constant 0.00999999977 : f32
    %18 = vector.broadcast %cst_11 : f32 to vector<8x128xf32>
    %19 = arith.mulf %18, %15 : vector<8x128xf32>
    %20 = arith.select %17, %15, %19 : vector<8x128xi1>, vector<8x128xf32>
    %21 = arith.addf %20, %12 : vector<8x128xf32>
    %22 = arith.truncf %21 : vector<8x128xf32> to vector<8x128xbf16>
    %c0_12 = arith.constant 0 : index
    %c0_13 = arith.constant 0 : index
    %23 = vector.load %arg5[%c0_12, %c0_13] : memref<128x128xbf16, #tpu.memory_space<vmem>>, vector<128x128xbf16>
    %cst_14 = arith.constant dense<0.000000e+00> : vector<8x128xf32>
    %24 = tpu.matmul %22, %23, %cst_14 {dimension_numbers = #tpu.dot_dimension_numbers<[1], [0], [0], [1], [0, 0, 1, 1], [], []>} : vector<8x128xbf16>, vector<128x128xbf16>, vector<8x128xf32> -> vector<8x128xf32>
    %cst_15 = arith.constant 0.000000e+00 : f32
    %25 = vector.broadcast %cst_15 : f32 to vector<8x128xf32>
    %26 = arith.cmpf ogt, %24, %25 : vector<8x128xf32>
    %cst_16 = arith.constant 0.00999999977 : f32
    %27 = vector.broadcast %cst_16 : f32 to vector<8x128xf32>
    %28 = arith.mulf %27, %24 : vector<8x128xf32>
    %29 = arith.select %26, %24, %28 : vector<8x128xi1>, vector<8x128xf32>
    %30 = arith.addf %29, %21 : vector<8x128xf32>
    %31 = arith.truncf %30 : vector<8x128xf32> to vector<8x128xbf16>
    %c0_17 = arith.constant 0 : index
    %c0_18 = arith.constant 0 : index
    %32 = vector.load %arg6[%c0_17, %c0_18] : memref<128x128xbf16, #tpu.memory_space<vmem>>, vector<128x128xbf16>
    %cst_19 = arith.constant dense<0.000000e+00> : vector<8x128xf32>
    %33 = tpu.matmul %31, %32, %cst_19 {dimension_numbers = #tpu.dot_dimension_numbers<[1], [0], [0], [1], [0, 0, 1, 1], [], []>} : vector<8x128xbf16>, vector<128x128xbf16>, vector<8x128xf32> -> vector<8x128xf32>
    %cst_20 = arith.constant 0.000000e+00 : f32
    %34 = vector.broadcast %cst_20 : f32 to vector<8x128xf32>
    %35 = arith.cmpf ogt, %33, %34 : vector<8x128xf32>
    %cst_21 = arith.constant 0.00999999977 : f32
    %36 = vector.broadcast %cst_21 : f32 to vector<8x128xf32>
    %37 = arith.mulf %36, %33 : vector<8x128xf32>
    %38 = arith.select %35, %33, %37 : vector<8x128xi1>, vector<8x128xf32>
    %39 = arith.addf %38, %30 : vector<8x128xf32>
    %40 = arith.truncf %39 : vector<8x128xf32> to vector<8x128xbf16>
    %c0_22 = arith.constant 0 : index
    %c0_23 = arith.constant 0 : index
    %41 = vector.load %arg7[%c0_22, %c0_23] : memref<128x128xbf16, #tpu.memory_space<vmem>>, vector<128x128xbf16>
    %cst_24 = arith.constant dense<0.000000e+00> : vector<8x128xf32>
    %42 = tpu.matmul %40, %41, %cst_24 {dimension_numbers = #tpu.dot_dimension_numbers<[1], [0], [0], [1], [0, 0, 1, 1], [], []>} : vector<8x128xbf16>, vector<128x128xbf16>, vector<8x128xf32> -> vector<8x128xf32>
    %cst_25 = arith.constant 0.000000e+00 : f32
    %43 = vector.broadcast %cst_25 : f32 to vector<8x128xf32>
    %44 = arith.subf %43, %42 : vector<8x128xf32>
    %45 = math.exp %44 : vector<8x128xf32>
    %cst_26 = arith.constant 1.000000e+00 : f32
    %46 = vector.broadcast %cst_26 : f32 to vector<8x128xf32>
    %47 = arith.addf %46, %45 : vector<8x128xf32>
    %cst_27 = arith.constant 1.000000e+00 : f32
    %48 = vector.broadcast %cst_27 : f32 to vector<8x128xf32>
    %49 = arith.divf %48, %47 : vector<8x128xf32>
    %c0_28 = arith.constant 0 : index
    %c0_29 = arith.constant 0 : index
    %50 = vector.load %arg8[%c0_28, %c0_29] : memref<8x128xf32, #tpu.memory_space<vmem>>, vector<8x128xf32>
    tpu.vector_store %arg8[%c0_28, %c0_29], %49 {strides = array<i32>} : memref<8x128xf32, #tpu.memory_space<vmem>>, vector<8x128xf32>,
    return
  }
  func.func @transform_0(%arg0: i32) -> (i32, i32) {
    %c0_i32 = arith.constant 0 : i32
    %c0_i32_0 = arith.constant 0 : i32
    return %arg0, %c0_i32 : i32, i32
  }
  func.func @transform_1(%arg0: i32) -> (i32, i32) {
    %c0_i32 = arith.constant 0 : i32
    %c0_i32_0 = arith.constant 0 : i32
    %c0_i32_1 = arith.constant 0 : i32
    return %c0_i32, %c0_i32_0 : i32, i32
  }
  func.func @transform_2(%arg0: i32) -> (i32, i32) {
    %c0_i32 = arith.constant 0 : i32
    %c0_i32_0 = arith.constant 0 : i32
    %c0_i32_1 = arith.constant 0 : i32
    return %c0_i32, %c0_i32_0 : i32, i32
  }
  func.func @transform_3(%arg0: i32) -> (i32, i32) {
    %c0_i32 = arith.constant 0 : i32
    %c0_i32_0 = arith.constant 0 : i32
    %c0_i32_1 = arith.constant 0 : i32
    return %c0_i32, %c0_i32_0 : i32, i32
  }
  func.func @transform_4(%arg0: i32) -> (i32, i32) {
    %c0_i32 = arith.constant 0 : i32
    %c0_i32_0 = arith.constant 0 : i32
    %c0_i32_1 = arith.constant 0 : i32
    return %c0_i32, %c0_i32_0 : i32, i32
  }
  func.func @transform_5(%arg0: i32) -> (i32, i32) {
    %c0_i32 = arith.constant 0 : i32
    %c0_i32_0 = arith.constant 0 : i32
    %c0_i32_1 = arith.constant 0 : i32
    return %c0_i32, %c0_i32_0 : i32, i32
  }
  func.func @transform_6(%arg0: i32) -> (i32, i32) {
    %c0_i32 = arith.constant 0 : i32
    %c0_i32_0 = arith.constant 0 : i32
    %c0_i32_1 = arith.constant 0 : i32
    return %c0_i32, %c0_i32_0 : i32, i32
  }
  func.func @transform_7(%arg0: i32) -> (i32, i32) {
    %c0_i32 = arith.constant 0 : i32
    %c0_i32_0 = arith.constant 0 : i32
    return %arg0, %c0_i32 : i32, i32
  }
}

</mosaic_0001>

<bundles_post_ra>
// kernel: resnet_forward.1
= control target key start
LH: loop header
LB: loop body
LE: loop exit
PB: predicated region body
PF: predicated region fallthrough
CT: control target
= control target key end

     0   :  { %v819_v0 = vmov 0.0   ;;  %vm820_vm0 = vmmov 0   ;;  %s1040_s1 = inlined_call_operand.vmem [shape: bf16[128,128], index: 1, kind: input, shape index: {}]   ;;  %s1041_s3 = inlined_call_operand.vmem [shape: bf16[128,128], index: 3, kind: input, shape index: {}]   ;;  %s1042_s0 = inlined_call_operand.vmem [shape: bf16[8,128], index: 0, kind: input, shape index: {}]   ;;  %s1043_s4 = inlined_call_operand.vmem [shape: bf16[128,128], index: 4, kind: input, shape index: {}]   ;;  %s1044_s2 = inlined_call_operand.vmem [shape: f32[1,128], index: 2, kind: input, shape index: {}]   ;;  %s1045_s5 = inlined_call_operand.vmem [shape: bf16[128,128], index: 5, kind: input, shape index: {}]   ;;  %s1046_s6 = inlined_call_operand.vmem [shape: bf16[128,128], index: 6, kind: input, shape index: {}]   ;;  %s1047_s7 = inlined_call_operand.vmem [shape: f32[8,128], index: 7, kind: output, shape index: {}]  }
   0x1   :  { %673 = vmatprep.subr.bf16.mxu0 %v819_v0  ;;  %v775_v1 = vld [vmem:[%s1040_s1] sm:$0xff]   ;;  %689 = vmatprep.mubr.msk.bf16.mxu0 %vm820_vm0, %v819_v0  ;;  %v776_v2 = vld [vmem:[%s1040_s1 + $0x8] sm:$0xff]   ;;  %v777_v3 = vld [vmem:[%s1040_s1 + $0x10] sm:$0xff]  }
   0x2   :  { %693 = vmatprep.subr.bf16.mxu1 %v819_v0  ;;  %709 = vmatprep.mubr.msk.bf16.mxu1 %vm820_vm0, %v819_v0  ;;  %v783_v4 = vld [vmem:[%s1041_s3] sm:$0xff]   ;;  %v778_v5 = vld [vmem:[%s1040_s1 + $0x18] sm:$0xff]   ;;  %v784_v6 = vld [vmem:[%s1041_s3 + $0x8] sm:$0xff]  }
   0x3   :  { %674 = vmatpush3.bf16.msra.mxu0 %v775_v1  ;;  %694 = vmatpush3.bf16.msra.mxu1 %v783_v4  ;;  %v779_v7 = vld [vmem:[%s1040_s1 + $0x20] sm:$0xff]   ;;  %v785_v8 = vld [vmem:[%s1041_s3 + $0x10] sm:$0xff]   ;;  %v780_v9 = vld [vmem:[%s1040_s1 + $0x28] sm:$0xff]  }
   0x4   :  { %675 = vmatprep.subr.bf16.mxu0 %v819_v0  ;;  %695 = vmatprep.subr.bf16.mxu1 %v819_v0  ;;  %v786_v10 = vld [vmem:[%s1041_s3 + $0x18] sm:$0xff]   ;;  %v781_v11 = vld [vmem:[%s1040_s1 + $0x30] sm:$0xff]   ;;  %v787_v12 = vld [vmem:[%s1041_s3 + $0x20] sm:$0xff]  }
   0x5   :  { %v782_v13 = vld [vmem:[%s1040_s1 + $0x38] sm:$0xff]   ;;  %v788_v14 = vld [vmem:[%s1041_s3 + $0x28] sm:$0xff]   ;;  %v27_v15 = vld [vmem:[%s1042_s0] sm:$0xf] }
   0x6   :  { %v789_v16 = vld [vmem:[%s1041_s3 + $0x30] sm:$0xff]   ;;  %v790_v17 = vld [vmem:[%s1041_s3 + $0x38] sm:$0xff]   ;;  %v791_v18 = vld [vmem:[%s1043_s4] sm:$0xff]   ;;  %v28_v28 = vunpack.c.l.bf16 %v27_v15 }
   0x7   :  { %676 = vmatpush3.bf16.msra.mxu0 %v776_v2  ;;  %696 = vmatpush3.bf16.msra.mxu1 %v784_v6  ;;  %v792_v19 = vld [vmem:[%s1043_s4 + $0x8] sm:$0xff]   ;;  %v793_v20 = vld [vmem:[%s1043_s4 + $0x10] sm:$0xff]   ;;  %v794_v21 = vld [vmem:[%s1043_s4 + $0x18] sm:$0xff]  }
   0x8   :  { %677 = vmatprep.subr.bf16.mxu0 %v819_v0  ;;  %697 = vmatprep.subr.bf16.mxu1 %v819_v0  ;;  %v795_v22 = vld [vmem:[%s1043_s4 + $0x20] sm:$0xff]   ;;  %v796_v23 = vld [vmem:[%s1043_s4 + $0x28] sm:$0xff]   ;;  %v797_v35 = vld [vmem:[%s1043_s4 + $0x30] sm:$0xff]  }
   0x9   :  { %v587_v24 = vld [vmem:[%s1044_s2] ss:$0 sm:$0xff]  ;;  %v798_v36 = vld [vmem:[%s1043_s4 + $0x38] sm:$0xff]   ;;  %v800_v38 = vld [vmem:[%s1045_s5 + $0x8] sm:$0xff]  }
   0xa   :  { %v799_v37 = vld [vmem:[%s1045_s5] sm:$0xff]   ;;  %v801_v39 = vld [vmem:[%s1045_s5 + $0x10] sm:$0xff]   ;;  %v802_v40 = vld [vmem:[%s1045_s5 + $0x18] sm:$0xff]  }
   0xb   :  { %678 = vmatpush3.bf16.msra.mxu0 %v777_v3  ;;  %698 = vmatpush3.bf16.msra.mxu1 %v785_v8  ;;  %v803_v41 = vld [vmem:[%s1045_s5 + $0x20] sm:$0xff]   ;;  %v804_v42 = vld [vmem:[%s1045_s5 + $0x28] sm:$0xff]   ;;  %v805_v51 = vld [vmem:[%s1045_s5 + $0x30] sm:$0xff]  }
   0xc   :  { %679 = vmatprep.subr.bf16.mxu0 %v819_v0  ;;  %699 = vmatprep.subr.bf16.mxu1 %v819_v0  ;;  %v806_v52 = vld [vmem:[%s1045_s5 + $0x38] sm:$0xff]   ;;  %v807_v53 = vld [vmem:[%s1046_s6] sm:$0xff]   ;;  %v808_v54 = vld [vmem:[%s1046_s6 + $0x8] sm:$0xff]  }
   0xd   :  { %v809_v55 = vld [vmem:[%s1046_s6 + $0x10] sm:$0xff]   ;;  %v810_v56 = vld [vmem:[%s1046_s6 + $0x18] sm:$0xff]   ;;  %v811_v57 = vld [vmem:[%s1046_s6 + $0x20] sm:$0xff]  }
   0xe   :  { %v812_v58 = vld [vmem:[%s1046_s6 + $0x28] sm:$0xff]   ;;  %v813_v4 = vld [vmem:[%s1046_s6 + $0x30] sm:$0xff]  }
   0xf   :  { %680 = vmatpush3.bf16.msra.mxu0 %v778_v5  ;;  %700 = vmatpush3.bf16.msra.mxu1 %v786_v10  ;;  %v814_v5 = vld [vmem:[%s1046_s6 + $0x38] sm:$0xff]  }
  0x10   :  { %681 = vmatprep.subr.bf16.mxu0 %v819_v0  ;;  %701 = vmatprep.subr.bf16.mxu1 %v819_v0 }
  0x13   :  { %682 = vmatpush3.bf16.msra.mxu0 %v779_v7  ;;  %702 = vmatpush3.bf16.msra.mxu1 %v787_v12 }
  0x14   :  { %683 = vmatprep.subr.bf16.mxu0 %v819_v0  ;;  %703 = vmatprep.subr.bf16.mxu1 %v819_v0 }
  0x17   :  { %684 = vmatpush3.bf16.msra.mxu0 %v780_v9  ;;  %704 = vmatpush3.bf16.msra.mxu1 %v788_v14 }
  0x18   :  { %685 = vmatprep.subr.bf16.mxu0 %v819_v0  ;;  %705 = vmatprep.subr.bf16.mxu1 %v819_v0 }
  0x1b   :  { %686 = vmatpush3.bf16.msra.mxu0 %v781_v11  ;;  %706 = vmatpush3.bf16.msra.mxu1 %v789_v16 }
  0x1c   :  { %687 = vmatprep.subr.bf16.mxu0 %v819_v0  ;;  %707 = vmatprep.subr.bf16.mxu1 %v819_v0 }
  0x1f   :  { %688 = vmatpush3.bf16.msra.mxu0 %v782_v13  ;;  %708 = vmatpush3.bf16.msra.mxu1 %v790_v17 }
  0x20   :  { %713 = vmatprep.subr.bf16.mxu0 %v819_v0  ;;  %733 = vmatprep.subr.bf16.mxu1 %v819_v0 }
  0x22   :  { %690 = vmatmul.mubr.bf16.vlgmr.msra.gmra.mrb[0].mxu0 %v27_v15 }
  0x23   :  { %729 = vmatprep.mubr.msk.bf16.mxu0 %vm820_vm0, %v819_v0  ;;  %714 = vmatpush3.bf16.msra.mxu0 %v791_v18 }
  0x24   :  { %715 = vmatprep.subr.bf16.mxu0 %v819_v0 }
  0x27   :  { %716 = vmatpush3.bf16.msra.mxu0 %v792_v19 }
  0x28   :  { %717 = vmatprep.subr.bf16.mxu0 %v819_v0 }
  0x2b   :  { %718 = vmatpush3.bf16.msra.mxu0 %v793_v20 }
  0x2c   :  { %719 = vmatprep.subr.bf16.mxu0 %v819_v0 }
  0x2f   :  { %720 = vmatpush3.bf16.msra.mxu0 %v794_v21 }
  0x30   :  { %721 = vmatprep.subr.bf16.mxu0 %v819_v0 }
  0x33   :  { %722 = vmatpush3.bf16.msra.mxu0 %v795_v22 }
  0x34   :  { %723 = vmatprep.subr.bf16.mxu0 %v819_v0 }
  0x37   :  { %724 = vmatpush3.bf16.msra.mxu0 %v796_v23 }
  0x38   :  { %725 = vmatprep.subr.bf16.mxu0 %v819_v0 }
  0x3b   :  { %726 = vmatpush3.bf16.msra.mxu0 %v797_v35 }
  0x3c   :  { %727 = vmatprep.subr.bf16.mxu0 %v819_v0 }
  0x3f   :  { %728 = vmatpush3.bf16.msra.mxu0 %v798_v36 }
  0x40   :  { %753 = vmatprep.subr.bf16.mxu0 %v819_v0 }
  0xf5   :  { %v134_v25 = vpop.f32.mrb[0].mxu0 }
  0xf6   :  { %v135_v26 = vadd.f32 %v587_v24, %v134_v25  ;;  %v691_v27 = vpop.f32.mrb[1].mxu0 }
  0xf7   :  { %v137_v29 = vpop.f32.mrb[2].mxu0 }
  0xf8   :  { %vm140_vm1 = vcmp.gt.f32.partialorder %v135_v26, 0.0  ;;  %v141_v30 = vmul.f32 0.01, %v135_v26  ;;  %v692_v31 = vpop.f32.mrb[3].mxu0 }
  0xfa   :  { %v142_v32 = vsel %vm140_vm1, %v135_v26, %v141_v30 }
  0xfb   :  { %v143_v33 = vadd.f32 %v142_v32, %v28_v28 }
  0xfd   :  { %v144_v34 = vpack.c.bf16 %v143_v33, %v143_v33 }
  0xff   :  { %710 = vmatmul.mubr.bf16.vlgmr.msra.gmra.mrb[0].mxu1 %v144_v34 }
 0x100   :  { %749 = vmatprep.mubr.msk.bf16.mxu1 %vm820_vm0, %v819_v0  ;;  %734 = vmatpush3.bf16.msra.mxu1 %v799_v37 }
 0x101   :  { %735 = vmatprep.subr.bf16.mxu1 %v819_v0 }
 0x104   :  { %736 = vmatpush3.bf16.msra.mxu1 %v800_v38 }
 0x105   :  { %737 = vmatprep.subr.bf16.mxu1 %v819_v0 }
 0x108   :  { %738 = vmatpush3.bf16.msra.mxu1 %v801_v39 }
 0x109   :  { %739 = vmatprep.subr.bf16.mxu1 %v819_v0 }
 0x10c   :  { %740 = vmatpush3.bf16.msra.mxu1 %v802_v40 }
 0x10d   :  { %741 = vmatprep.subr.bf16.mxu1 %v819_v0 }
 0x110   :  { %742 = vmatpush3.bf16.msra.mxu1 %v803_v41 }
 0x111   :  { %743 = vmatprep.subr.bf16.mxu1 %v819_v0 }
 0x114   :  { %744 = vmatpush3.bf16.msra.mxu1 %v804_v42 }
 0x115   :  { %745 = vmatprep.subr.bf16.mxu1 %v819_v0 }
 0x118   :  { %746 = vmatpush3.bf16.msra.mxu1 %v805_v51 }
 0x119   :  { %747 = vmatprep.subr.bf16.mxu1 %v819_v0 }
 0x11c   :  { %748 = vmatpush3.bf16.msra.mxu1 %v806_v52 }
 0x1d2   :  { %v243_v43 = vpop.f32.mrb[0].mxu1 }
 0x1d3   :  { %vm249_vm2 = vcmp.gt.f32.partialorder %v243_v43, 0.0  ;;  %v250_v44 = vmul.f32 0.01, %v243_v43  ;;  %v711_v45 = vpop.f32.mrb[1].mxu1 }
 0x1d4   :  { %v246_v46 = vpop.f32.mrb[2].mxu1 }
 0x1d5   :  { %v251_v47 = vsel %vm249_vm2, %v243_v43, %v250_v44  ;;  %v712_v48 = vpop.f32.mrb[3].mxu1 }
 0x1d6   :  { %v252_v49 = vadd.f32 %v251_v47, %v143_v33 }
 0x1d8   :  { %v253_v50 = vpack.c.bf16 %v252_v49, %v252_v49 }
 0x1da   :  { %730 = vmatmul.mubr.bf16.vlgmr.msra.gmra.mrb[4].mxu0 %v253_v50 }
 0x1db   :  { %769 = vmatprep.mubr.msk.bf16.mxu0 %vm820_vm0, %v819_v0  ;;  %754 = vmatpush3.bf16.msra.mxu0 %v807_v53 }
 0x1dc   :  { %755 = vmatprep.subr.bf16.mxu0 %v819_v0 }
 0x1df   :  { %756 = vmatpush3.bf16.msra.mxu0 %v808_v54 }
 0x1e0   :  { %757 = vmatprep.subr.bf16.mxu0 %v819_v0 }
 0x1e3   :  { %758 = vmatpush3.bf16.msra.mxu0 %v809_v55 }
 0x1e4   :  { %759 = vmatprep.subr.bf16.mxu0 %v819_v0 }
 0x1e7   :  { %760 = vmatpush3.bf16.msra.mxu0 %v810_v56 }
 0x1e8   :  { %761 = vmatprep.subr.bf16.mxu0 %v819_v0 }
 0x1eb   :  { %762 = vmatpush3.bf16.msra.mxu0 %v811_v57 }
 0x1ec   :  { %763 = vmatprep.subr.bf16.mxu0 %v819_v0 }
 0x1ef   :  { %764 = vmatpush3.bf16.msra.mxu0 %v812_v58 }
 0x1f0   :  { %765 = vmatprep.subr.bf16.mxu0 %v819_v0 }
 0x1f3   :  { %766 = vmatpush3.bf16.msra.mxu0 %v813_v4 }
 0x1f4   :  { %767 = vmatprep.subr.bf16.mxu0 %v819_v0 }
 0x1f7   :  { %768 = vmatpush3.bf16.msra.mxu0 %v814_v5 }
 0x2ad   :  { %v352_v59 = vpop.f32.mrb[4].mxu0 }
 0x2ae   :  { %vm358_vm3 = vcmp.gt.f32.partialorder %v352_v59, 0.0  ;;  %v359_v60 = vmul.f32 0.01, %v352_v59  ;;  %v731_v61 = vpop.f32.mrb[5].mxu0 }
 0x2af   :  { %v355_v62 = vpop.f32.mrb[6].mxu0 }
 0x2b0   :  { %v360_v63 = vsel %vm358_vm3, %v352_v59, %v359_v60  ;;  %v732_v1 = vpop.f32.mrb[7].mxu0 }
 0x2b1   :  { %v361_v2 = vadd.f32 %v360_v63, %v252_v49 }
 0x2b3   :  { %v362_v3 = vpack.c.bf16 %v361_v2, %v361_v2 }
 0x2b5   :  { %750 = vmatmul.mubr.bf16.vlgmr.msra.gmra.mrb[4].mxu1 %v362_v3 }
 0x388   :  { %v461_v6 = vpop.f32.mrb[4].mxu1 }
 0x389   :  { %vm467_vm4 = vcmp.gt.f32.partialorder %v461_v6, 0.0  ;;  %v468_v7 = vmul.f32 0.01, %v461_v6  ;;  %v751_v8 = vpop.f32.mrb[5].mxu1 }
 0x38a   :  { %v464_v9 = vpop.f32.mrb[6].mxu1 }
 0x38b   :  { %v469_v10 = vsel %vm467_vm4, %v461_v6, %v468_v7  ;;  %v752_v11 = vpop.f32.mrb[7].mxu1 }
 0x38c   :  { %v470_v12 = vadd.f32 %v469_v10, %v361_v2 }
 0x38e   :  { %v471_v13 = vpack.c.bf16 %v470_v12, %v470_v12 }
 0x390   :  { %770 = vmatmul.mubr.bf16.vlgmr.msra.gmra.mrb[8].mxu0 %v471_v13 }
 0x463   :  { %v570_v14 = vpop.f32.mrb[8].mxu0 }
 0x464   :  { %v576_v15 = vsub.f32 0.0, %v570_v14  ;;  %v771_v16 = vpop.f32.mrb[9].mxu0 }
 0x465   :  { %v573_v17 = vpop.f32.mrb[10].mxu0 }
 0x466   :  { %v577_v0 = vmul.f32 1.442695, %v576_v15  ;;  %v772_v18 = vpop.f32.mrb[11].mxu0 }
 0x468   :  { %815 = vpow2.f32 %v577_v0 }
 0x472   :  { %v816_v19 = vpop.eup %815 }
 0x473   :  { %v579_v20 = vadd.f32 1.0, %v816_v19 }
 0x475   :  { %817 = vrcp.f32 %v579_v20 }
 0x47f   :  { %v818_v21 = vpop.eup %817 }
 0x480   :  { %582 = vst [vmem:[%s1047_s7] sm:$0xff] %v818_v21 }

</bundles_post_ra>
